<compile_context>
chip_gen: v6e
topology: v6e:2x2x1
jax: 0.10.0
libtpu: 0.0.40
codegen_flags: <defaults>
</compile_context>

<pallas_src>
import jax
import jax.numpy as jnp
from jax.experimental import pallas as pl
from jax.experimental.pallas import tpu as pltpu

_MAX_BATCH_BLOCK = 1024  # rows per grid step (upper bound)
_LANE = 128              # TPU lane width


def _round_up(x, m):
    return ((x + m - 1) // m) * m


def _choose_block(batch):
    """Batch rows per grid step: lane-multiple, >=2 steps when B > 128."""
    if batch <= _LANE:
        return _LANE
    bb = _round_up(pl.cdiv(batch, 2), _LANE)   # aim for >= 2 steps (v7x megacore)
    return min(bb, _MAX_BATCH_BLOCK)


def _qfunction_kernel(s_ref, a_ref, w1s_ref, w1a_ref, b1_ref, w2_ref, b2_ref,
                      out_ref):
    # Layer 1: two MXU pushes over the (state | action) row-split of W1.
    # f32 accumulation regardless of the streamed dtype.
    h = jnp.dot(s_ref[...], w1s_ref[...], preferred_element_type=jnp.float32)
    h = h + jnp.dot(a_ref[...], w1a_ref[...], preferred_element_type=jnp.float32)
    h = jnp.maximum(h + b1_ref[...], 0.0)                     # (bb, hidden), VPU

    # Layer 2 (N=1 head): contract hidden with the batch landing on lanes:
    # (1, hidden) x (bb, hidden)^T -> (1, bb).  Lane-dense => unmasked stores.
    q = jax.lax.dot_general(
        w2_ref[...], h,
        dimension_numbers=(((1,), (1,)), ((), ())),
        preferred_element_type=jnp.float32)                   # (1, bb)

    out_ref[...] = (q + b2_ref[0, 0]).astype(out_ref.dtype)


def qfunction_forward(state, action, params, *, compute_dtype=jnp.bfloat16):
    """state: (B, state_dim), action: (B, action_dim) -> (B, 1) float32."""
    w1, b1, w2_row, b2 = params
    state = jnp.asarray(state)
    action = jnp.asarray(action)
    B, state_dim = state.shape
    _, action_dim = action.shape
    hidden_dim = w1.shape[1]

    bb = _choose_block(B)
    num_blocks = pl.cdiv(B, bb)
    padded_B = num_blocks * bb

    # Streamed activations (and W1) in the compute dtype; accumulation is f32.
    s = state.astype(compute_dtype)
    a = action.astype(compute_dtype)
    if B < bb:
        # Tiny batch: pad up to a single full block (cheap).  For B >= bb with
        # a ragged tail we do NOT pad -- the last block's OOB rows read
        # undefined data, produce garbage rows, and are sliced away below.
        s = jnp.pad(s, ((0, bb - B), (0, 0)))
        a = jnp.pad(a, ((0, bb - B), (0, 0)))

    w1_s = w1[:state_dim].astype(compute_dtype)               # (state_dim, hidden)
    w1_a = w1[state_dim:].astype(compute_dtype)               # (action_dim, hidden)
    b1_f = b1.astype(jnp.float32).reshape(1, hidden_dim)
    w2_f = w2_row.astype(jnp.float32).reshape(1, hidden_dim)
    b2_f = b2.astype(jnp.float32).reshape(1, 1)

    out = pl.pallas_call(
        _qfunction_kernel,
        out_shape=jax.ShapeDtypeStruct((1, padded_B), jnp.float32),
        grid=(num_blocks,),
        in_specs=[
            pl.BlockSpec((bb, state_dim), lambda i: (i, 0)),          # pipelined
            pl.BlockSpec((bb, action_dim), lambda i: (i, 0)),         # pipelined
            pl.BlockSpec((state_dim, hidden_dim), lambda i: (0, 0)),  # resident
            pl.BlockSpec((action_dim, hidden_dim), lambda i: (0, 0)),
            pl.BlockSpec((1, hidden_dim), lambda i: (0, 0)),
            pl.BlockSpec((1, hidden_dim), lambda i: (0, 0)),
            pl.BlockSpec(memory_space=pltpu.MemorySpace.SMEM),        # b2 scalar
        ],
        out_specs=pl.BlockSpec((1, bb), lambda i: (0, i)),            # lane-dense
        compiler_params=pltpu.CompilerParams(
            dimension_semantics=("parallel",),                        # megacore
        ),
    )(s, a, w1_s, w1_a, b1_f, w2_f, b2_f)

    return out.reshape(padded_B, 1)[:B]


def init_qfunction_params(key, state_dim, action_dim, hidden_dim):
    """Deterministic synthetic init matching nn.Linear shapes.

    W1 is stored transposed as (in_dim, hidden); W2 as its PyTorch layout
    (1, hidden); b2 as (1, 1).  All float32.
    """
    k1, k2, k3, k4 = jax.random.split(key, 4)
    in_dim = state_dim + action_dim
    lim1 = 1.0 / jnp.sqrt(in_dim)
    lim2 = 1.0 / jnp.sqrt(hidden_dim)
    w1 = jax.random.uniform(k1, (in_dim, hidden_dim), jnp.float32, -lim1, lim1)
    b1 = jax.random.uniform(k2, (1, hidden_dim), jnp.float32, -lim1, lim1)
    w2_row = jax.random.uniform(k3, (1, hidden_dim), jnp.float32, -lim2, lim2)
    b2 = jax.random.uniform(k4, (1, 1), jnp.float32, -lim2, lim2)
    return (w1, b1, w2_row, b2)


def qfunction_reference(state, action, params):
    """Pure-JAX reference (full precision) for correctness checks."""
    w1, b1, w2_row, b2 = params
    x = jnp.concatenate([state, action], axis=1)
    h = jnp.maximum(
        jnp.dot(x, w1, precision=jax.lax.Precision.HIGHEST) + b1, 0.0)
    return jnp.dot(h, w2_row.T, precision=jax.lax.Precision.HIGHEST) + b2


if __name__ == "__main__":
    key = jax.random.PRNGKey(0)
    k_state, k_action, k_params, k_state2, k_action2 = jax.random.split(key, 5)

    # Check 1: tiny batch (module-scale shapes), f32 streaming, single block.
    batch, state_dim, action_dim, hidden_dim = 8, 8, 2, 32
    state = jax.random.normal(k_state, (batch, state_dim), jnp.float32)
    action = jax.random.normal(k_action, (batch, action_dim), jnp.float32)
    params = init_qfunction_params(k_params, state_dim, action_dim, hidden_dim)

    q_f32 = jax.block_until_ready(
        qfunction_forward(state, action, params, compute_dtype=jnp.float32))
    q_ref = qfunction_reference(state, action, params)
    assert q_f32.shape == (batch, 1), q_f32.shape
    assert jnp.allclose(q_f32, q_ref, atol=1e-2, rtol=1e-2), (q_f32, q_ref)

    # Check 2: default bf16 streaming path (v6e/v7x roofline), looser tolerance.
    q_bf16 = jax.block_until_ready(qfunction_forward(state, action, params))
    assert q_bf16.shape == (batch, 1), q_bf16.shape
    assert jnp.allclose(q_bf16, q_ref, atol=5e-2, rtol=5e-2), (q_bf16, q_ref)

    # Check 3: multi-block grid with a ragged tail (no input padding copy).
    batch2 = 300
    state2 = jax.random.normal(k_state2, (batch2, state_dim), jnp.float32)
    action2 = jax.random.normal(k_action2, (batch2, action_dim), jnp.float32)
    q2 = jax.block_until_ready(
        qfunction_forward(state2, action2, params, compute_dtype=jnp.float32))
    q2_ref = qfunction_reference(state2, action2, params)
    assert q2.shape == (batch2, 1), q2.shape
    assert jnp.allclose(q2, q2_ref, atol=1e-2, rtol=1e-2), (q2, q2_ref)

    print("KERNEL_OK")
</pallas_src>

<mosaic_0001>
module attributes {stable_mosaic.version = 11 : i64} {
  func.func @_qfunction_kernel(%arg0: i32, %arg1: memref<128x8xf32, #tpu.memory_space<vmem>>, %arg2: memref<128x2xf32, #tpu.memory_space<vmem>>, %arg3: memref<8x32xf32, #tpu.memory_space<vmem>>, %arg4: memref<2x32xf32, #tpu.memory_space<vmem>>, %arg5: memref<1x32xf32, #tpu.memory_space<vmem>>, %arg6: memref<1x32xf32, #tpu.memory_space<vmem>>, %arg7: memref<1x1xf32, #tpu.memory_space<smem>>, %arg8: memref<1x128xf32, #tpu.memory_space<vmem>>) attributes {dimension_semantics = [#tpu.dimension_semantics<parallel>], iteration_bounds = array<i64: 1>, scalar_prefetch = 0 : i64, scratch_operands = 0 : i64, tpu.core_type = #tpu.core_type<tc>, window_params = [{transform_indices = @transform_0, window_bounds = array<i64: 128, 8>}, {transform_indices = @transform_1, window_bounds = array<i64: 128, 2>}, {pipeline_mode = #tpu.pipeline_mode<synchronous>, transform_indices = @transform_2, window_bounds = array<i64: 8, 32>}, {pipeline_mode = #tpu.pipeline_mode<synchronous>, transform_indices = @transform_3, window_bounds = array<i64: 2, 32>}, {pipeline_mode = #tpu.pipeline_mode<synchronous>, transform_indices = @transform_4, window_bounds = array<i64: 1, 32>}, {pipeline_mode = #tpu.pipeline_mode<synchronous>, transform_indices = @transform_5, window_bounds = array<i64: 1, 32>}, {transform_indices = @transform_6, window_bounds = array<i64: 1, 1>}, {transform_indices = @transform_7, window_bounds = array<i64: 1, 128>}]} {
    %c0 = arith.constant 0 : index
    %c0_0 = arith.constant 0 : index
    %0 = vector.load %arg1[%c0, %c0_0] : memref<128x8xf32, #tpu.memory_space<vmem>>, vector<128x8xf32>
    %c0_1 = arith.constant 0 : index
    %c0_2 = arith.constant 0 : index
    %1 = vector.load %arg3[%c0_1, %c0_2] : memref<8x32xf32, #tpu.memory_space<vmem>>, vector<8x32xf32>
    %cst = arith.constant dense<0.000000e+00> : vector<128x32xf32>
    %2 = tpu.matmul %0, %1, %cst {dimension_numbers = #tpu.dot_dimension_numbers<[1], [0], [0], [1], [0, 0, 1, 1], [], []>} : vector<128x8xf32>, vector<8x32xf32>, vector<128x32xf32> -> vector<128x32xf32>
    %c0_3 = arith.constant 0 : index
    %c0_4 = arith.constant 0 : index
    %3 = vector.load %arg2[%c0_3, %c0_4] : memref<128x2xf32, #tpu.memory_space<vmem>>, vector<128x2xf32>
    %c0_5 = arith.constant 0 : index
    %c0_6 = arith.constant 0 : index
    %4 = vector.load %arg4[%c0_5, %c0_6] : memref<2x32xf32, #tpu.memory_space<vmem>>, vector<2x32xf32>
    %cst_7 = arith.constant dense<0.000000e+00> : vector<128x32xf32>
    %5 = tpu.matmul %3, %4, %cst_7 {dimension_numbers = #tpu.dot_dimension_numbers<[1], [0], [0], [1], [0, 0, 1, 1], [], []>} : vector<128x2xf32>, vector<2x32xf32>, vector<128x32xf32> -> vector<128x32xf32>
    %6 = arith.addf %2, %5 : vector<128x32xf32>
    %c0_8 = arith.constant 0 : index
    %c0_9 = arith.constant 0 : index
    %7 = vector.load %arg5[%c0_8, %c0_9] : memref<1x32xf32, #tpu.memory_space<vmem>>, vector<1x32xf32>
    %8 = vector.broadcast %7 : vector<1x32xf32> to vector<128x32xf32>
    %9 = arith.addf %6, %8 : vector<128x32xf32>
    %cst_10 = arith.constant 0.000000e+00 : f32
    %10 = vector.broadcast %cst_10 : f32 to vector<128x32xf32>
    %11 = arith.maximumf %9, %10 : vector<128x32xf32>
    %c0_11 = arith.constant 0 : index
    %c0_12 = arith.constant 0 : index
    %12 = vector.load %arg6[%c0_11, %c0_12] : memref<1x32xf32, #tpu.memory_space<vmem>>, vector<1x32xf32>
    %cst_13 = arith.constant dense<0.000000e+00> : vector<1x128xf32>
    %13 = tpu.matmul %12, %11, %cst_13 {dimension_numbers = #tpu.dot_dimension_numbers<[1], [1], [0], [0], [0, 0, 1, 0], [], []>} : vector<1x32xf32>, vector<128x32xf32>, vector<1x128xf32> -> vector<1x128xf32>
    %c0_14 = arith.constant 0 : index
    %c0_15 = arith.constant 0 : index
    %14 = memref.load %arg7[%c0_14, %c0_15] : memref<1x1xf32, #tpu.memory_space<smem>>
    %15 = vector.broadcast %14 : f32 to vector<1x128xf32>
    %16 = arith.addf %13, %15 : vector<1x128xf32>
    %c0_16 = arith.constant 0 : index
    %c0_17 = arith.constant 0 : index
    %17 = vector.load %arg8[%c0_16, %c0_17] : memref<1x128xf32, #tpu.memory_space<vmem>>, vector<1x128xf32>
    tpu.vector_store %arg8[%c0_16, %c0_17], %16 {strides = array<i32>} : memref<1x128xf32, #tpu.memory_space<vmem>>, vector<1x128xf32>,
    return
  }
  func.func @transform_0(%arg0: i32) -> (i32, i32) {
    %c0_i32 = arith.constant 0 : i32
    %c0_i32_0 = arith.constant 0 : i32
    return %arg0, %c0_i32 : i32, i32
  }
  func.func @transform_1(%arg0: i32) -> (i32, i32) {
    %c0_i32 = arith.constant 0 : i32
    %c0_i32_0 = arith.constant 0 : i32
    return %arg0, %c0_i32 : i32, i32
  }
  func.func @transform_2(%arg0: i32) -> (i32, i32) {
    %c0_i32 = arith.constant 0 : i32
    %c0_i32_0 = arith.constant 0 : i32
    %c0_i32_1 = arith.constant 0 : i32
    return %c0_i32, %c0_i32_0 : i32, i32
  }
  func.func @transform_3(%arg0: i32) -> (i32, i32) {
    %c0_i32 = arith.constant 0 : i32
    %c0_i32_0 = arith.constant 0 : i32
    %c0_i32_1 = arith.constant 0 : i32
    return %c0_i32, %c0_i32_0 : i32, i32
  }
  func.func @transform_4(%arg0: i32) -> (i32, i32) {
    %c0_i32 = arith.constant 0 : i32
    %c0_i32_0 = arith.constant 0 : i32
    %c0_i32_1 = arith.constant 0 : i32
    return %c0_i32, %c0_i32_0 : i32, i32
  }
  func.func @transform_5(%arg0: i32) -> (i32, i32) {
    %c0_i32 = arith.constant 0 : i32
    %c0_i32_0 = arith.constant 0 : i32
    %c0_i32_1 = arith.constant 0 : i32
    return %c0_i32, %c0_i32_0 : i32, i32
  }
  func.func @transform_6(%arg0: i32) -> (i32, i32) {
    %c0_i32 = arith.constant 0 : i32
    %c0_i32_0 = arith.constant 0 : i32
    %c0_i32_1 = arith.constant 0 : i32
    return %c0_i32, %c0_i32_0 : i32, i32
  }
  func.func @transform_7(%arg0: i32) -> (i32, i32) {
    %c0_i32 = arith.constant 0 : i32
    %c0_i32_0 = arith.constant 0 : i32
    return %c0_i32, %arg0 : i32, i32
  }
}

</mosaic_0001>

<bundles_post_ra>
// kernel: tpu_custom_call.1
= control target key start
LH: loop header
LB: loop body
LE: loop exit
PB: predicated region body
PF: predicated region fallthrough
CT: control target
= control target key end

     0   :  { %vm111_vm0 = vcmask 1041408   ;;  %vm62_vm1 = vcmask 15360   ;;  %s1112_s0 = inlined_call_operand.vmem [shape: f32[128,8], index: 0, kind: input, shape index: {}]   ;;  %s1113_s1 = inlined_call_operand.vmem [shape: f32[128,2], index: 1, kind: input, shape index: {}]   ;;  %s1114_s2 = inlined_call_operand.vmem [shape: f32[8,32], index: 2, kind: input, shape index: {}]   ;;  %s1115_s3 = inlined_call_operand.vmem [shape: f32[2,32], index: 3, kind: input, shape index: {}]   ;;  %s1116_s4 = inlined_call_operand.vmem [shape: f32[1,32], index: 4, kind: input, shape index: {}]   ;;  %s1117_s5 = inlined_call_operand.vmem [shape: f32[1,32], index: 5, kind: input, shape index: {}]   ;;  %s1118_s6 = inlined_call_operand.<no memory space> [shape: f32[1,1], index: 6, kind: input, shape index: {}]   ;;  %s1119_s7 = inlined_call_operand.hbm [shape: f32[1,128], index: 7, kind: output, shape index: {}]  }
   0x1   :  { %v61_v0 = vld [vmem:[%s1115_s3] sm:$0x3]  ;;  %v46_v2 = vld [vmem:[%s1113_s1 + $0x8] sm:$0xff]  ;;  %v47_v4 = vld [vmem:[%s1113_s1 + $0x10] sm:$0xff] }
   0x2   :  { %v45_v1 = vld [vmem:[%s1113_s1] sm:$0xff]  ;;  %735 = vmatprep.subr.msk.mxu1 %vm111_vm0, %v61_v0  ;;  %v48_v5 = vld [vmem:[%s1113_s1 + $0x18] sm:$0xff]  ;;  %v50_v7 = vld [vmem:[%s1113_s1 + $0x28] sm:$0xff] }
   0x3   :  { %737 = vmatprep.mubr.msk.f32.mxu1 %vm62_vm1, %v45_v1  ;;  %v44_v3 = vld [vmem:[%s1114_s2] sm:$0xff]  ;;  %736 = vmatpush3.msk.msra.mxu1 %vm111_vm0, %v61_v0  ;;  %v51_v8 = vld [vmem:[%s1113_s1 + $0x30] sm:$0xff] }
   0x4   :  { %738 = vmatmul.mubr.msk.f32.vlgmr.msra.gmra.mxu1 %vm62_vm1, %v46_v2  ;;  %761 = vmatprep.subr.mxu1 %v44_v3  ;;  %v49_v6 = vld [vmem:[%s1113_s1 + $0x20] sm:$0xff] }
   0x5   :  { %762 = vmatpush3.msra.mxu1 %v44_v3  ;;  %740 = vmatprep.mubr.msk.f32.mxu1 %vm62_vm1, %v47_v4 }
   0x8   :  { %741 = vmatmul.mubr.msk.f32.gmra.mxu1 %vm62_vm1, %v48_v5 }
   0x9   :  { %743 = vmatprep.mubr.msk.f32.mxu1 %vm62_vm1, %v49_v6 }
   0xc   :  { %744 = vmatmul.mubr.msk.f32.gmra.mxu1 %vm62_vm1, %v50_v7 }
   0xd   :  { %13 = vsyncpa [#allocation4], 0  ;;  %746 = vmatprep.mubr.msk.f32.mxu1 %vm62_vm1, %v51_v8  ;;  %v52_v9 = vld [vmem:[%s1113_s1 + $0x38] sm:$0xff]  ;;  %v53_v10 = vld [vmem:[%s1113_s1 + $0x40] sm:$0xff]  ;;  %vm260_vm2 = vcmask 64512   ;;  %v847_v34 = vmov 0.0  }
   0xe   :  { %v54_v11 = vld [vmem:[%s1113_s1 + $0x48] sm:$0xff]  ;;  %v55_v12 = vld [vmem:[%s1113_s1 + $0x50] sm:$0xff]  ;;  %v56_v13 = vld [vmem:[%s1113_s1 + $0x58] sm:$0xff]  ;;  %787 = vmatprep.subr.mxu0 %v847_v34  ;;  %vm848_vm3 = vmmov 0   ;;  %vm496_vm4 = vcmask 261120   ;;  %s849_s19 = smov [#allocation3]  }
   0xf   :  { %v57_v14 = vld [vmem:[%s1113_s1 + $0x60] sm:$0xff]  ;;  %v58_v15 = vld [vmem:[%s1113_s1 + $0x68] sm:$0xff]  ;;  %v59_v16 = vld [vmem:[%s1113_s1 + $0x70] sm:$0xff]  ;;  %819 = vmatprep.mubr.msk.f32.mxu0 %vm848_vm3, %v847_v34  ;;  %s625_s20 = sshll.u32 %s849_s19, 4  ;;  %s626_s20 = int_to_ptr.vmem [resolvable:$true] %s625_s20 }
  0x10   :  { %747 = vmatmul.mubr.msk.f32.gmra.mxu1 %vm62_vm1, %v52_v9  ;;  %v60_v17 = vld [vmem:[%s1113_s1 + $0x78] sm:$0xff]  ;;  %v28_v18 = vld [vmem:[%s1112_s0] sm:$0xff]  ;;  %v29_v19 = vld [vmem:[%s1112_s0 + $0x8] sm:$0xff]  ;;  %s825_s21 = scalar_lea.vmem %s626_s20, 16  ;;  %s829_s22 = scalar_lea.vmem %s626_s20, 32 }
  0x11   :  { %749 = vmatprep.mubr.msk.f32.mxu1 %vm62_vm1, %v53_v10  ;;  %v30_v20 = vld [vmem:[%s1112_s0 + $0x10] sm:$0xff]  ;;  %v31_v21 = vld [vmem:[%s1112_s0 + $0x18] sm:$0xff]  ;;  %v32_v22 = vld [vmem:[%s1112_s0 + $0x20] sm:$0xff]  ;;  %p826_p0 = scmp.ne.s32.totalorder %s626_s20, %s825_s21  ;;  %p830_p1 = scmp.lt.s32.totalorder %s626_s20, %s626_s20 }
  0x12   :  { %v33_v23 = vld [vmem:[%s1112_s0 + $0x28] sm:$0xff]  ;;  %v34_v24 = vld [vmem:[%s1112_s0 + $0x30] sm:$0xff]  ;;  %v35_v25 = vld [vmem:[%s1112_s0 + $0x38] sm:$0xff]  ;;  %p831_p2 = scmp.lt.s32.totalorder %s829_s22, %s825_s21 }
  0x13   :  { %v36_v26 = vld [vmem:[%s1112_s0 + $0x40] sm:$0xff]  ;;  %v37_v27 = vld [vmem:[%s1112_s0 + $0x48] sm:$0xff]  ;;  %v38_v28 = vld [vmem:[%s1112_s0 + $0x50] sm:$0xff] }
  0x14   :  { %750 = vmatmul.mubr.msk.f32.gmra.mxu1 %vm62_vm1, %v54_v11  ;;  %v39_v29 = vld [vmem:[%s1112_s0 + $0x58] sm:$0xff]  ;;  %v40_v30 = vld [vmem:[%s1112_s0 + $0x60] sm:$0xff]  ;;  %v41_v31 = vld [vmem:[%s1112_s0 + $0x68] sm:$0xff]  ;;  %p832_p3 = por %p831_p2, %p830_p1 }
  0x15   :  { %752 = vmatprep.mubr.msk.f32.mxu1 %vm62_vm1, %v55_v12  ;;  %v42_v32 = vld [vmem:[%s1112_s0 + $0x70] sm:$0xff]  ;;  %v43_v33 = vld [vmem:[%s1112_s0 + $0x78] sm:$0xff]  ;;  %v1045_v7 = vld [vmem:[%s1116_s4] ss:$0 sm:$0xff] }
  0x16   :  { %p833_p4 = pnand %p832_p3, %p826_p0 }
  0x18   :  { %753 = vmatmul.mubr.msk.f32.gmra.mxu1 %vm62_vm1, %v56_v13 }
  0x19   :  { %755 = vmatprep.mubr.msk.f32.mxu1 %vm62_vm1, %v57_v14 }
  0x1c   :  { %756 = vmatmul.mubr.msk.f32.gmra.mxu1 %vm62_vm1, %v58_v15 }
  0x1d   :  { %758 = vmatprep.mubr.msk.f32.mxu1 %vm62_vm1, %v59_v16 }
  0x20   :  { %759 = vmatmul.mubr.msk.f32.gmra.mxu1 %vm62_vm1, %v60_v17 }
  0x21   :  { %763 = vmatprep.mubr.msk.f32.mxu1 %vm260_vm2, %v28_v18 }
  0x24   :  { %764 = vmatmul.mubr.msk.f32.vlgmr.msra.gmra.mxu1 %vm260_vm2, %v29_v19 }
  0x25   :  { %766 = vmatprep.mubr.msk.f32.mxu1 %vm260_vm2, %v30_v20 }
  0x28   :  { %767 = vmatmul.mubr.msk.f32.gmra.mxu1 %vm260_vm2, %v31_v21 }
  0x29   :  { %769 = vmatprep.mubr.msk.f32.mxu1 %vm260_vm2, %v32_v22 }
  0x2c   :  { %770 = vmatmul.mubr.msk.f32.gmra.mxu1 %vm260_vm2, %v33_v23 }
  0x2d   :  { %772 = vmatprep.mubr.msk.f32.mxu1 %vm260_vm2, %v34_v24 }
  0x30   :  { %773 = vmatmul.mubr.msk.f32.gmra.mxu1 %vm260_vm2, %v35_v25 }
  0x31   :  { %775 = vmatprep.mubr.msk.f32.mxu1 %vm260_vm2, %v36_v26 }
  0x34   :  { %776 = vmatmul.mubr.msk.f32.gmra.mxu1 %vm260_vm2, %v37_v27 }
  0x35   :  { %778 = vmatprep.mubr.msk.f32.mxu1 %vm260_vm2, %v38_v28 }
  0x38   :  { %779 = vmatmul.mubr.msk.f32.gmra.mxu1 %vm260_vm2, %v39_v29 }
  0x39   :  { %781 = vmatprep.mubr.msk.f32.mxu1 %vm260_vm2, %v40_v30 }
  0x3c   :  { %782 = vmatmul.mubr.msk.f32.gmra.mxu1 %vm260_vm2, %v41_v31 }
  0x3d   :  { %784 = vmatprep.mubr.msk.f32.mxu1 %vm260_vm2, %v42_v32 }
  0x40   :  { %785 = vmatmul.mubr.msk.f32.gmra.mxu1 %vm260_vm2, %v43_v33 }
  0xc4   :  { %v739_v35 = vpop.f32.mrf.mxu1 }
  0xc6   :  { %v181_v36 = vpop.f32.mrf.mxu1 }
  0xc8   :  { %v742_v37 = vpop.f32.mrf.mxu1 }
  0xca   :  { %v191_v38 = vpop.f32.mrf.mxu1 }
  0xcc   :  { %v1026_v39 = vpop.f32.mrf.mxu1 }
  0xce   :  { %v1028_v40 = vpop.f32.mrf.mxu1 }
  0xd0   :  { %v1030_v41 = vpop.f32.mrf.mxu1 }
  0xd2   :  { %v1032_v42 = vpop.f32.mrf.mxu1 }
  0xd4   :  { %v751_v43 = vpop.f32.mrf.mxu1 }
  0xd6   :  { %v221_v44 = vpop.f32.mrf.mxu1 }
  0xd8   :  { %v754_v45 = vpop.f32.mrf.mxu1 }
  0xda   :  { %v231_v46 = vpop.f32.mrf.mxu1 }
  0xdc   :  { %v757_v47 = vpop.f32.mrf.mxu1 }
  0xde   :  { %v241_v48 = vpop.f32.mrf.mxu1 }
  0xe0   :  { %v760_v49 = vpop.f32.mrf.mxu1 }
  0xe2   :  { %v251_v50 = vpop.f32.mrf.mxu1 }
  0xe4   :  { %v765_v51 = vpop.f32.mrf.mxu1 }
  0xe5   :  { %v1034_v52 = vadd.f32 %v765_v51, %v739_v35 }
  0xe6   :  { %v375_v53 = vpop.f32.mrf.mxu1 }
  0xe7   :  { %v1036_v54 = vadd.f32 %v375_v53, %v181_v36 }
  0xe8   :  { %v768_v55 = vpop.f32.mrf.mxu1 }
  0xe9   :  { %v1038_v56 = vadd.f32 %v768_v55, %v742_v37  ;;  %v461_v51 = vadd.f32 %v1045_v7, %v1036_v54  ;;  %v495_v55 = vstv %s1118_s6 }
  0xea   :  { %v385_v57 = vpop.f32.mrf.mxu1 }
  0xeb   :  { %v1040_v58 = vadd.f32 %v385_v57, %v191_v38  ;;  %v477_v53 = vmax.f32 %v461_v51, 0.0 }
  0xec   :  { %v771_v59 = vpop.f32.mrf.mxu1 }
  0xed   :  { %v401_v36 = vadd.f32 %v771_v59, %v1026_v39  ;;  %v464_v39 = vadd.f32 %v1045_v7, %v1038_v56 }
  0xee   :  { %v395_v60 = vpop.f32.mrf.mxu1 }
  0xf0   :  { %v774_v61 = vpop.f32.mrf.mxu1 }
  0xf1   :  { %v411_v29 = vadd.f32 %v774_v61, %v1030_v41  ;;  %v466_v41 = vadd.f32 %v1045_v7, %v401_v36 }
  0xf2   :  { %v405_v62 = vpop.f32.mrf.mxu1 }
  0xf3   :  { %v468_v32 = vadd.f32 %v1045_v7, %v411_v29  ;;  %v406_v33 = vadd.f32 %v405_v62, %v1032_v42  ;;  %v482_v42 = vmax.f32 %v466_v41, 0.0 }
  0xf4   :  { %v777_v63 = vpop.f32.mrf.mxu1 }
  0xf5   :  { %v421_v23 = vadd.f32 %v777_v63, %v751_v43  ;;  %v484_v37 = vmax.f32 %v468_v32, 0.0  ;;  %v467_v38 = vadd.f32 %v1045_v7, %v406_v33  ;;  %v396_v43 = vadd.f32 %v395_v60, %v1028_v40 }
  0xf6   :  { %v415_v0 = vpop.f32.mrf.mxu1  ;;  %v480_v40 = vmax.f32 %v464_v39, 0.0 }
  0xf7   :  { %v470_v26 = vadd.f32 %v1045_v7, %v421_v23  ;;  %v416_v27 = vadd.f32 %v415_v0, %v221_v44  ;;  %v483_v44 = vmax.f32 %v467_v38, 0.0 }
  0xf8   :  { %v780_v1 = vpop.f32.mrf.mxu1 }
  0xf9   :  { %v431_v17 = vadd.f32 %v780_v1, %v754_v45  ;;  %v486_v30 = vmax.f32 %v470_v26, 0.0  ;;  %v469_v31 = vadd.f32 %v1045_v7, %v416_v27  ;;  %v465_v45 = vadd.f32 %v1045_v7, %v396_v43 }
  0xfa   :  { %v425_v2 = vpop.f32.mrf.mxu1 }
  0xfb   :  { %v472_v20 = vadd.f32 %v1045_v7, %v431_v17  ;;  %v426_v21 = vadd.f32 %v425_v2, %v231_v46  ;;  %v485_v35 = vmax.f32 %v469_v31, 0.0  ;;  %v481_v46 = vmax.f32 %v465_v45, 0.0 }
  0xfc   :  { %v783_v3 = vpop.f32.mrf.mxu1 }
  0xfd   :  { %v441_v11 = vadd.f32 %v783_v3, %v757_v47  ;;  %v488_v24 = vmax.f32 %v472_v20, 0.0  ;;  %v471_v25 = vadd.f32 %v1045_v7, %v426_v21  ;;  %v463_v47 = vadd.f32 %v1045_v7, %v1040_v58 }
  0xfe   :  { %v435_v4 = vpop.f32.mrf.mxu1 }
  0xff   :  { %v474_v14 = vadd.f32 %v1045_v7, %v441_v11  ;;  %v436_v15 = vadd.f32 %v435_v4, %v241_v48  ;;  %v487_v28 = vmax.f32 %v471_v25, 0.0  ;;  %v462_v48 = vadd.f32 %v1045_v7, %v1034_v52  ;;  %v493_v52 = vld [vmem:[%s1117_s5] sm:$0x1] }
 0x100   :  { %v786_v5 = vpop.f32.mrf.mxu1 }
 0x101   :  { %v451_v6 = vadd.f32 %v786_v5, %v760_v49  ;;  %v490_v18 = vmax.f32 %v474_v14, 0.0  ;;  %v473_v19 = vadd.f32 %v1045_v7, %v436_v15  ;;  %v479_v49 = vmax.f32 %v463_v47, 0.0 }
 0x102   :  { %v445_v8 = vpop.f32.mrf.mxu1 }
 0x103   :  { %v476_v9 = vadd.f32 %v1045_v7, %v451_v6  ;;  %v446_v10 = vadd.f32 %v445_v8, %v251_v50  ;;  %v489_v22 = vmax.f32 %v473_v19, 0.0  ;;  %v478_v50 = vmax.f32 %v462_v48, 0.0 }
 0x105   :  { %v492_v12 = vmax.f32 %v476_v9, 0.0  ;;  %v475_v13 = vadd.f32 %v1045_v7, %v446_v10 }
 0x107   :  { %788 = vmatpush3.xpose.msk.msra.mxu0 %vm496_vm4, %v492_v12  ;;  %v491_v16 = vmax.f32 %v475_v13, 0.0 }
 0x108   :  { %789 = vmatprep.subr.mxu0 %v847_v34 }
 0x10b   :  { %790 = vmatpush3.xpose.msk.msra.mxu0 %vm496_vm4, %v491_v16 }
 0x10c   :  { %791 = vmatprep.subr.mxu0 %v847_v34 }
 0x10f   :  { %792 = vmatpush3.xpose.msk.msra.mxu0 %vm496_vm4, %v490_v18 }
 0x110   :  { %793 = vmatprep.subr.mxu0 %v847_v34 }
 0x113   :  { %794 = vmatpush3.xpose.msk.msra.mxu0 %vm496_vm4, %v489_v22 }
 0x114   :  { %795 = vmatprep.subr.mxu0 %v847_v34 }
 0x117   :  { %796 = vmatpush3.xpose.msk.msra.mxu0 %vm496_vm4, %v488_v24 }
 0x118   :  { %797 = vmatprep.subr.mxu0 %v847_v34 }
 0x11b   :  { %798 = vmatpush3.xpose.msk.msra.mxu0 %vm496_vm4, %v487_v28 }
 0x11c   :  { %799 = vmatprep.subr.mxu0 %v847_v34 }
 0x11f   :  { %800 = vmatpush3.xpose.msk.msra.mxu0 %vm496_vm4, %v486_v30 }
 0x120   :  { %801 = vmatprep.subr.mxu0 %v847_v34 }
 0x123   :  { %802 = vmatpush3.xpose.msk.msra.mxu0 %vm496_vm4, %v485_v35 }
 0x124   :  { %803 = vmatprep.subr.mxu0 %v847_v34 }
 0x127   :  { %804 = vmatpush3.xpose.msk.msra.mxu0 %vm496_vm4, %v484_v37 }
 0x128   :  { %805 = vmatprep.subr.mxu0 %v847_v34 }
 0x12b   :  { %806 = vmatpush3.xpose.msk.msra.mxu0 %vm496_vm4, %v483_v44 }
 0x12c   :  { %807 = vmatprep.subr.mxu0 %v847_v34 }
 0x12f   :  { %808 = vmatpush3.xpose.msk.msra.mxu0 %vm496_vm4, %v482_v42 }
 0x130   :  { %809 = vmatprep.subr.mxu0 %v847_v34 }
 0x133   :  { %810 = vmatpush3.xpose.msk.msra.mxu0 %vm496_vm4, %v481_v46 }
 0x134   :  { %811 = vmatprep.subr.mxu0 %v847_v34 }
 0x137   :  { %812 = vmatpush3.xpose.msk.msra.mxu0 %vm496_vm4, %v480_v40 }
 0x138   :  { %813 = vmatprep.subr.mxu0 %v847_v34 }
 0x13b   :  { %814 = vmatpush3.xpose.msk.msra.mxu0 %vm496_vm4, %v479_v49 }
 0x13c   :  { %815 = vmatprep.subr.mxu0 %v847_v34 }
 0x13f   :  { %816 = vmatpush3.xpose.msk.msra.mxu0 %vm496_vm4, %v478_v50 }
 0x140   :  { %817 = vmatprep.subr.mxu0 %v847_v34 }
 0x143   :  { %818 = vmatpush3.xpose.msk.msra.mxu0 %vm496_vm4, %v477_v53 }
 0x146   :  { %820 = vmatmul.mubr.msk.f32.vlgmr.msra.gmra.mxu0 %vm496_vm4, %v493_v52 }
 0x206   :  { %v614_v54 = vpop.f32.mrf.mxu0 }
 0x207   :  { %v615_v56 = vadd.f32 %v614_v54, %v495_v55 }
 0x208   :  { %v821_v57 = vpop.f32.mrf.mxu0 }
 0x209   :  { %618 = vst [vmem:[#allocation3] sm:$0x1] %v615_v56 }
 0x20a   :  { %836 = shalt.err (!%p833_p4)
}
 0x20b   :  { %628 = dma.vmem_to_hbm [thread:$0]  %s626_s20, 16, %s1119_s7, [#allocation4]  }
 0x20c   :  { %845 = dma.done.wait [#allocation4], 16  }
 0x20d   :  { %846 = vsyncadd [#allocation4], 4294967280 }
 0x20e   :  { %632 = vsyncpa [#allocation4], 1 }

</bundles_post_ra>
